<compile_context>
chip_gen: v7x
topology: tpu7x:2x2x1
jax: 0.10.0
libtpu: 0.0.40
codegen_flags: <defaults>
</compile_context>

<pallas_src>
import functools

import jax
import jax.numpy as jnp
from jax.experimental import pallas as pl
from jax.experimental.pallas import tpu as pltpu


def _round_up(x: int, m: int) -> int:
    return (x + m - 1) // m * m


def _cdiv(a: int, b: int) -> int:
    return -(-a // b)


# ---------------------------------------------------------------------------
# Kernel: one (tile_b, tile_c) output block = tanh(x_tile @ W_col_tile + b_tile)
# ---------------------------------------------------------------------------
def comparior_kernel(x_ref, w_ref, b_ref, o_ref):
    # x_ref: (tile_b, H)       CLS activations (compute dtype)
    # w_ref: (H, tile_c)       weight column block (compute dtype)
    # b_ref: (1, tile_c)       bias column block (f32)
    # o_ref: (tile_b, tile_c)  output block
    acc = jnp.dot(x_ref[...], w_ref[...],
                  preferred_element_type=jnp.float32)            # MXU, f32 acc
    o_ref[...] = jnp.tanh(acc + b_ref[...]).astype(o_ref.dtype)  # EUP tanh


# ---------------------------------------------------------------------------
# One-time parameter prep (hoisted out of the per-call path, per perf review):
# cast to the compute dtype and pad the class dim to a multiple of 128 lanes.
# Weight layout is [H_in, C_out] (transpose of torch nn.Linear's [out, in]).
# ---------------------------------------------------------------------------
def prepare_comparior_params(weight, bias, compute_dtype=jnp.bfloat16):
    H, C = weight.shape
    assert bias.shape == (C,), (bias.shape, C)
    C_pad = _round_up(C, 128)
    w = weight.astype(compute_dtype)
    b = bias.astype(jnp.float32)
    if C_pad != C:  # skip entirely when C is already lane-dense (768/1024/...)
        w = jnp.pad(w, ((0, 0), (0, C_pad - C)))
        b = jnp.pad(b, (0, C_pad - C))
    return w, b.reshape(1, C_pad)


@functools.partial(
    jax.jit, static_argnames=("orig_c", "block_b", "block_c", "out_dtype"))
def comparior_apply(hidden_states, w, b2, *, orig_c,
                    block_b=256, block_c=512, out_dtype=None):
    """tanh(hidden_states[:, 0] @ W + b) with pre-prepared (cast/padded) W, b.

    hidden_states: (B, S, H)
    w:             (H, C_pad)  prepared weight ([in, out] layout, C padded to 128)
    b2:            (1, C_pad)  prepared bias (f32)
    returns:       (B, orig_c)
    """
    B, S, H = hidden_states.shape
    Hw, C_pad = w.shape
    assert Hw == H, (
        f"weight must be [H_in={H}, C_out]; got {w.shape} "
        "(pass the transpose of torch nn.Linear's weight)")
    assert C_pad % 128 == 0 and orig_c <= C_pad
    compute_dtype = w.dtype
    if out_dtype is None:
        out_dtype = hidden_states.dtype

    # CLS token only — the kernel never touches the (B, S, H) slab.
    cls = hidden_states[:, 0, :].astype(compute_dtype)

    # --- Batch tiling: balanced tiles, minimal padding (no ~2x overshoot). ---
    SUB = 16  # sublane pack safe for bf16 (16) and f32 (8)
    n_b = max(1, _cdiv(B, block_b))
    tile_b = _round_up(_cdiv(B, n_b), SUB)
    B_pad = _round_up(B, tile_b)
    n_b = B_pad // tile_b
    if B_pad != B:
        cls = jnp.pad(cls, ((0, B_pad - B), (0, 0)))

    # --- Column tiling of weight/output: largest 128-multiple divisor <= block_c.
    n_lane_blocks = C_pad // 128
    d = min(n_lane_blocks, max(1, block_c // 128))
    while n_lane_blocks % d != 0:
        d -= 1
    tile_c = d * 128
    n_c = C_pad // tile_c

    # Weight/bias are fully resident when there is a single column block, so a
    # single pipeline buffer suffices (halves the dominant VMEM footprint).
    wb_mode = pl.Buffered(1) if n_c == 1 else pl.Buffered(2)

    # Explicit VMEM budget with headroom (v5e scoped default ~16 MiB, v7x 32 MiB).
    itm = jnp.dtype(compute_dtype).itemsize
    out_itm = jnp.dtype(out_dtype).itemsize
    vmem_bytes = ((1 if n_c == 1 else 2) * H * tile_c * itm   # weight buffer(s)
                  + 2 * tile_b * H * itm                      # CLS row buffers
                  + 2 * tile_b * tile_c * out_itm             # output buffers
                  + 2 * 8 * tile_c * 4)                       # bias buffers
    vmem_limit = min(max(int(vmem_bytes * 1.25) + (4 << 20), 16 << 20), 128 << 20)

    # TODO(synk): for very large H (>= ~2K on v5e, ~4K on v7x) also tile the K
    # (H_in) dimension with an f32 VMEM accumulator; unnecessary at pooler sizes.
    out = pl.pallas_call(
        comparior_kernel,
        out_shape=jax.ShapeDtypeStruct((B_pad, C_pad), out_dtype),
        # Column axis leads: each weight column block is fetched once in total,
        # and on v7x the two TensorCores shard the column axis so each streams
        # only its half of W (the CLS rows, which are tiny, are re-read instead).
        grid=(n_c, n_b),
        in_specs=[
            pl.BlockSpec((tile_b, H), lambda j, i: (i, 0)),
            pl.BlockSpec((H, tile_c), lambda j, i: (0, j), pipeline_mode=wb_mode),
            pl.BlockSpec((1, tile_c), lambda j, i: (0, j), pipeline_mode=wb_mode),
        ],
        out_specs=pl.BlockSpec((tile_b, tile_c), lambda j, i: (i, j)),
        compiler_params=pltpu.CompilerParams(
            dimension_semantics=("parallel", "parallel"),
            vmem_limit_bytes=vmem_limit),
    )(cls, w, b2)

    # Slice only if padding was actually added (avoids an extra B x C copy).
    if B_pad != B or C_pad != orig_c:
        out = out[:B, :orig_c]
    return out


def comparior(hidden_states, weight, bias, *, compute_dtype=jnp.bfloat16, **kw):
    """Convenience path: preps params per call. Prefer prepare_comparior_params
    once at init + comparior_apply per forward to avoid repeated weight traffic."""
    w, b2 = prepare_comparior_params(weight, bias, compute_dtype)
    return comparior_apply(hidden_states, w, b2, orig_c=weight.shape[1], **kw)


def comparior_ref(hidden_states, weight, bias):
    # Pure-JAX reference mirroring the PyTorch forward exactly (f32).
    return jnp.tanh(hidden_states[:, 0] @ weight + bias)


if __name__ == "__main__":
    # Small shapes consistent with the module's forward: (B, S, H), C == H.
    B, S, H = 2, 8, 32

    key = jax.random.PRNGKey(0)
    k_x, k_w, k_b = jax.random.split(key, 3)

    hidden_states = jax.random.normal(k_x, (B, S, H), dtype=jnp.float32)

    # Deterministic nn.Linear-style init: U(-1/sqrt(H), 1/sqrt(H)),
    # stored in [in, out] layout (transpose of torch's [out, in]).
    bound = 1.0 / (H ** 0.5)
    weight = jax.random.uniform(k_w, (H, H), minval=-bound, maxval=bound,
                                dtype=jnp.float32)
    bias = jax.random.uniform(k_b, (H,), minval=-bound, maxval=bound,
                              dtype=jnp.float32)

    ref = comparior_ref(hidden_states, weight, bias)

    # Exact-semantics path (f32 compute), params prepared once at "init" time.
    w32, b32 = prepare_comparior_params(weight, bias, compute_dtype=jnp.float32)
    out_f32 = jax.block_until_ready(
        comparior_apply(hidden_states, w32, b32, orig_c=H))
    assert out_f32.shape == (B, H), out_f32.shape
    assert jnp.allclose(out_f32, ref, atol=1e-5, rtol=1e-5), "f32 mismatch vs reference"

    # Default fast path (bf16 weight/activations, f32 MXU accumulation).
    wbf, bbf = prepare_comparior_params(weight, bias)   # cached once at init
    out_bf16 = jax.block_until_ready(
        comparior_apply(hidden_states, wbf, bbf, orig_c=H))
    assert out_bf16.shape == (B, H), out_bf16.shape
    assert jnp.allclose(out_bf16, ref, atol=2e-2, rtol=2e-2), "bf16 mismatch vs reference"

    # Convenience wrapper (per-call prep) stays available and must also match.
    out_conv = jax.block_until_ready(comparior(hidden_states, weight, bias))
    assert out_conv.shape == (B, H), out_conv.shape
    assert jnp.allclose(out_conv, ref, atol=2e-2, rtol=2e-2), "wrapper mismatch"

    print("KERNEL_OK")
</pallas_src>

<mosaic_0001>
module attributes {stable_mosaic.version = 11 : i64} {
  func.func @comparior_kernel(%arg0: i32, %arg1: i32, %arg2: memref<16x32xf32, #tpu.memory_space<vmem>>, %arg3: memref<32x128xf32, #tpu.memory_space<vmem>>, %arg4: memref<1x128xf32, #tpu.memory_space<vmem>>, %arg5: memref<16x128xf32, #tpu.memory_space<vmem>>) attributes {dimension_semantics = [#tpu.dimension_semantics<parallel>, #tpu.dimension_semantics<parallel>], iteration_bounds = array<i64: 1, 1>, scalar_prefetch = 0 : i64, scratch_operands = 0 : i64, tpu.core_type = #tpu.core_type<tc>, window_params = [{transform_indices = @transform_0, window_bounds = array<i64: 16, 32>}, {pipeline_mode = #tpu.pipeline_mode<synchronous>, transform_indices = @transform_1, window_bounds = array<i64: 32, 128>}, {pipeline_mode = #tpu.pipeline_mode<synchronous>, transform_indices = @transform_2, window_bounds = array<i64: 1, 128>}, {transform_indices = @transform_3, window_bounds = array<i64: 16, 128>}]} {
    %c0 = arith.constant 0 : index
    %c0_0 = arith.constant 0 : index
    %0 = vector.load %arg2[%c0, %c0_0] : memref<16x32xf32, #tpu.memory_space<vmem>>, vector<16x32xf32>
    %c0_1 = arith.constant 0 : index
    %c0_2 = arith.constant 0 : index
    %1 = vector.load %arg3[%c0_1, %c0_2] : memref<32x128xf32, #tpu.memory_space<vmem>>, vector<32x128xf32>
    %cst = arith.constant dense<0.000000e+00> : vector<16x128xf32>
    %2 = tpu.matmul %0, %1, %cst {dimension_numbers = #tpu.dot_dimension_numbers<[1], [0], [0], [1], [0, 0, 1, 1], [], []>} : vector<16x32xf32>, vector<32x128xf32>, vector<16x128xf32> -> vector<16x128xf32>
    %c0_3 = arith.constant 0 : index
    %c0_4 = arith.constant 0 : index
    %3 = vector.load %arg4[%c0_3, %c0_4] : memref<1x128xf32, #tpu.memory_space<vmem>>, vector<1x128xf32>
    %4 = vector.broadcast %3 : vector<1x128xf32> to vector<16x128xf32>
    %5 = arith.addf %2, %4 : vector<16x128xf32>
    %6 = math.tanh %5 : vector<16x128xf32>
    %c0_5 = arith.constant 0 : index
    %c0_6 = arith.constant 0 : index
    %7 = vector.load %arg5[%c0_5, %c0_6] : memref<16x128xf32, #tpu.memory_space<vmem>>, vector<16x128xf32>
    tpu.vector_store %arg5[%c0_5, %c0_6], %6 {strides = array<i32>} : memref<16x128xf32, #tpu.memory_space<vmem>>, vector<16x128xf32>,
    return
  }
  func.func @transform_0(%arg0: i32, %arg1: i32) -> (i32, i32) {
    %c0_i32 = arith.constant 0 : i32
    %c0_i32_0 = arith.constant 0 : i32
    return %arg1, %c0_i32 : i32, i32
  }
  func.func @transform_1(%arg0: i32, %arg1: i32) -> (i32, i32) {
    %c0_i32 = arith.constant 0 : i32
    %c0_i32_0 = arith.constant 0 : i32
    return %c0_i32, %arg0 : i32, i32
  }
  func.func @transform_2(%arg0: i32, %arg1: i32) -> (i32, i32) {
    %c0_i32 = arith.constant 0 : i32
    %c0_i32_0 = arith.constant 0 : i32
    return %c0_i32, %arg0 : i32, i32
  }
  func.func @transform_3(%arg0: i32, %arg1: i32) -> (i32, i32) {
    %c0_i32 = arith.constant 0 : i32
    return %arg1, %arg0 : i32, i32
  }
}

</mosaic_0001>

<bundles_post_ra>
// kernel: comparior_apply.1
= control target key start
LH: loop header
LB: loop body
LE: loop exit
PB: predicated region body
PF: predicated region fallthrough
CT: control target
= control target key end

     0   :  { %8 = vsyncpa [#allocation3], 0  ;;  %s191_s12 = smov [#allocation2]   ;;  %s241_s0 = inlined_call_operand.vmem [shape: f32[16,32], index: 0, kind: input, shape index: {}]   ;;  %s242_s1 = inlined_call_operand.hbm [shape: f32[32,128], index: 1, kind: input, shape index: {}]   ;;  %s243_s2 = inlined_call_operand.vmem [shape: f32[1,128], index: 2, kind: input, shape index: {}]   ;;  %s244_s3 = inlined_call_operand.vmem [shape: f32[16,128], index: 3, kind: output, shape index: {}]  }
   0x1   :  { %s16_s13 = sshll.u32 %s191_s12, 4  ;;  %s167_s16 = scalar_lea.hbm %s242_s1, 512  ;;  %s17_s13 = int_to_ptr.vmem [resolvable:$true] %s16_s13 }
   0x2   :  { %p168_p0 = scmp.ne.s32.totalorder %s242_s1, %s167_s16  ;;  %p171_p1 = scmp.lt.u32.totalorder %s167_s16, %s242_s1 }
   0x4   :  { %p173_p2 = pnand %p171_p1, %p168_p0 }
   0x6   :  { %176 = shalt.err (!%p173_p2)
}
   0x7   :  { %s177_s21 = scalar_lea.vmem %s17_s13, 512  ;;  %p182_p4 = scmp.lt.s32.totalorder %s17_s13, %s17_s13 }
   0x8   :  { %p178_p3 = scmp.ne.s32.totalorder %s17_s13, %s177_s21  ;;  %p183_p5 = scmp.lt.s32.totalorder %s177_s21, %s177_s21 }
   0xa   :  { %p184_p6 = por %p183_p5, %p182_p4 }
   0xc   :  { %p185_p7 = pnand %p184_p6, %p178_p3 }
   0xe   :  { %188 = shalt.err (!%p185_p7)
}
   0xf   :  { %s192_s22 = smov 128   ;;  %s193_s23 = smov 8  }
  0x10   :  { %22 = dma.hbm_to_vmem [thread:$0]  %s242_s1, 512, %s17_s13, [#allocation3], %s192_s22, %s192_s22, %s193_s23  }
  0x11   :  { %189 = dma.done.wait [#allocation3], 512  }
  0x12   :  { %190 = vsyncadd [#allocation3], 4294966784  ;;  %vm41_vm0 = vcmask 261120   ;;  %v30_v0 = vld [vmem:[#allocation2] sm:$0xff]  ;;  %v31_v1 = vld [vmem:[#allocation2 + $0x8] sm:$0xff] }
  0x13   :  { %v32_v2 = vld [vmem:[#allocation2 + $0x10] sm:$0xff]  ;;  %v152_v3 = vpack.c.bf16 %v31_v1, %v30_v0  ;;  %v33_v4 = vld [vmem:[#allocation2 + $0x18] sm:$0xff]  ;;  %v28_v5 = vld [vmem:[%s241_s0] sm:$0xff] }
  0x14   :  { %v156_v6 = vpack.c.bf16 %v33_v4, %v32_v2  ;;  %149 = vmatprep.mubr.msk.f32.mxu0 %vm41_vm0, %v28_v5  ;;  %v29_v7 = vld [vmem:[%s241_s0 + $0x8] sm:$0xff]  ;;  %v132_v8 = vld [vmem:[%s243_s2] ss:$0 sm:$0xff] }
  0x15   :  { %153 = vmatprep.subr.bf16.mxu0 %v152_v3 }
  0x16   :  { %155 = vmatpush3.bf16.msra.mxu0 %v152_v3 }
  0x17   :  { %157 = vmatprep.subr.bf16.mxu0 %v156_v6 }
  0x1a   :  { %159 = vmatpush3.bf16.msra.mxu0 %v156_v6 }
  0x1d   :  { %150 = vmatmul.mubr.msk.f32.vlgmr.msra.gmra.mrb[0].mxu0 %vm41_vm0, %v29_v7 }
  0xf0   :  { %v151_v9 = vpop.f32.mrb[0].mxu0 }
  0xf1   :  { %v120_v10 = vadd.f32 %v151_v9, %v132_v8  ;;  %v114_v11 = vpop.f32.mrb[1].mxu0 }
  0xf2   :  { %v115_v12 = vadd.f32 %v132_v8, %v114_v11 }
  0xf3   :  { %163 = vtanh.f32 %v120_v10 }
  0xf4   :  { %165 = vtanh.f32 %v115_v12 }
  0xfd   :  { %v164_v13 = vpop.eup %163 }
  0xfe   :  { %v166_v14 = vpop.eup %165  ;;  %126 = vst [vmem:[%s244_s3 + $0x8] sm:$0xff] %v164_v13 }
  0xff   :  { %125 = vst [vmem:[%s244_s3] sm:$0xff] %v166_v14 }
 0x100   :  { %131 = vsyncpa [#allocation3], 1 }

</bundles_post_ra>
